<compile_context>
chip_gen: v7x
topology: tpu7x:2x2x1
jax: 0.10.0
libtpu: 0.0.40
codegen_flags: <defaults>
</compile_context>

<pallas_src>
import jax
import jax.numpy as jnp
from jax.experimental import pallas as pl
from jax.experimental.pallas import tpu as pltpu


def _pad_add_relu_kernel(x_ref, add_ref, o_ref):
    # x_ref:   (B, IN=4)   VMEM
    # add_ref: (1, OUT=8)  VMEM (broadcast over batch)
    # o_ref:   (B, OUT=8)  VMEM
    #
    # v1 = x @ W.T with W = [I4; 0] is exactly [x | zeros]; build that padded
    # activation in-register, then one vadd + one vmax + ONE store.
    B, IN = x_ref.shape
    OUT = o_ref.shape[-1]
    xp = jnp.pad(x_ref[...], ((0, 0), (0, OUT - IN)))          # (B, OUT) in-register
    o_ref[...] = jnp.maximum(xp + add_ref[...], 0.0)           # single full-tile store


def fused_linear_add_relu(x, add):
    """relu(x @ W.T + add) with W = [I_4; 0] (the module's constant weight)."""
    B, IN = x.shape
    OUT = add.shape[-1]
    cost = pl.CostEstimate(
        flops=2 * B * OUT,                       # add + relu over (B, OUT)
        transcendentals=0,
        bytes_accessed=4 * (B * IN + OUT + B * OUT),
    )
    return pl.pallas_call(
        _pad_add_relu_kernel,
        out_shape=jax.ShapeDtypeStruct((B, OUT), jnp.float32),
        # Whole arrays, no grid, no pipelining: everything fits in one vreg tile.
        in_specs=[
            pl.BlockSpec(memory_space=pltpu.MemorySpace.VMEM),
            pl.BlockSpec(memory_space=pltpu.MemorySpace.VMEM),
        ],
        out_specs=pl.BlockSpec(memory_space=pltpu.MemorySpace.VMEM),
        cost_estimate=cost,
    )(x, add)


if __name__ == "__main__":
    key = jax.random.PRNGKey(0)
    kx, ka = jax.random.split(key)

    # x1 ~ randn(1, 4), deterministic
    x1 = jax.random.normal(kx, (1, 4), dtype=jnp.float32)
    # some_tensor: deterministic (1, 8) tensor (undefined global in reference)
    some_tensor = jax.random.normal(ka, (1, 8), dtype=jnp.float32)

    out = fused_linear_add_relu(x1, some_tensor)
    out = jax.block_until_ready(out)

    # Reference check in plain JAX using the *explicit* constant weight,
    # validating that the in-kernel fold matches the original linear layer.
    w = jnp.zeros((8, 4), dtype=jnp.float32)
    w = w.at[jnp.arange(4), jnp.arange(4)].set(1.0)
    ref = jnp.maximum(x1 @ w.T + some_tensor, 0.0)

    assert out.shape == (1, 8)
    assert jnp.allclose(out, ref, atol=1e-6), "mismatch vs reference"

    print("KERNEL_OK")
</pallas_src>

<mosaic_0001>
module attributes {stable_mosaic.version = 11 : i64} {
  func.func @_pad_add_relu_kernel(%arg0: memref<1x4xf32, #tpu.memory_space<vmem>>, %arg1: memref<1x8xf32, #tpu.memory_space<vmem>>, %arg2: memref<1x8xf32, #tpu.memory_space<vmem>>) attributes {dimension_semantics = [], scalar_prefetch = 0 : i64, scratch_operands = 0 : i64, tpu.core_type = #tpu.core_type<tc>} {
    %c0 = arith.constant 0 : index
    %c0_0 = arith.constant 0 : index
    %0 = vector.load %arg0[%c0, %c0_0] : memref<1x4xf32, #tpu.memory_space<vmem>>, vector<1x4xf32>
    %c0_i32 = arith.constant 0 : i32
    %1 = arith.sitofp %c0_i32 : i32 to f32
    %2 = vector.broadcast %1 : f32 to vector<1x4xf32>
    %3 = tpu.concatenate %0, %2 in 1 : vector<1x4xf32>, vector<1x4xf32> -> vector<1x8xf32>
    %c0_1 = arith.constant 0 : index
    %c0_2 = arith.constant 0 : index
    %4 = vector.load %arg1[%c0_1, %c0_2] : memref<1x8xf32, #tpu.memory_space<vmem>>, vector<1x8xf32>
    %5 = arith.addf %3, %4 : vector<1x8xf32>
    %cst = arith.constant 0.000000e+00 : f32
    %6 = vector.broadcast %cst : f32 to vector<1x8xf32>
    %7 = arith.maximumf %5, %6 : vector<1x8xf32>
    %c0_3 = arith.constant 0 : index
    %c0_4 = arith.constant 0 : index
    %8 = vector.load %arg2[%c0_3, %c0_4] : memref<1x8xf32, #tpu.memory_space<vmem>>, vector<1x8xf32>
    tpu.vector_store %arg2[%c0_3, %c0_4], %7 {strides = array<i32>} : memref<1x8xf32, #tpu.memory_space<vmem>>, vector<1x8xf32>,
    return
  }
}

</mosaic_0001>

<bundles_post_ra>
// kernel: tpu_custom_call.1
= control target key start
LH: loop header
LB: loop body
LE: loop exit
PB: predicated region body
PF: predicated region fallthrough
CT: control target
= control target key end

     0   :  { %7 = vsyncpa [#allocation3], 0  ;;  %s141_s0 = inlined_call_operand.hbm [shape: f32[1,4], index: 0, kind: input, shape index: {}]   ;;  %s142_s1 = inlined_call_operand.vmem [shape: f32[1,8], index: 1, kind: input, shape index: {}]   ;;  %s143_s2 = inlined_call_operand.hbm [shape: f32[1,8], index: 2, kind: output, shape index: {}]  }
   0x1   :  { %8 = vsyncpa [#allocation4], 0  ;;  %s97_s9 = smov [#allocation2]   ;;  %s49_s13 = scalar_lea.hbm %s141_s0, 16 }
   0x2   :  { %s15_s10 = sshll.u32 %s97_s9, 4  ;;  %p50_p0 = scmp.ne.s32.totalorder %s141_s0, %s49_s13  ;;  %s16_s10 = int_to_ptr.vmem [resolvable:$true] %s15_s10 }
   0x3   :  { %p53_p1 = scmp.lt.u32.totalorder %s49_s13, %s141_s0 }
   0x5   :  { %p55_p2 = pnand %p53_p1, %p50_p0 }
   0x7   :  { %58 = shalt.err (!%p55_p2)
}
   0x8   :  { %s59_s18 = scalar_lea.vmem %s16_s10, 16  ;;  %s63_s19 = scalar_lea.vmem %s16_s10, 32 }
   0x9   :  { %p60_p3 = scmp.ne.s32.totalorder %s16_s10, %s59_s18  ;;  %p64_p4 = scmp.lt.s32.totalorder %s16_s10, %s16_s10 }
   0xa   :  { %p65_p5 = scmp.lt.s32.totalorder %s63_s19, %s59_s18 }
   0xc   :  { %p66_p6 = por %p65_p5, %p64_p4 }
   0xe   :  { %p67_p7 = pnand %p66_p6, %p60_p3 }
  0x10   :  { %70 = shalt.err (!%p67_p7)
}
  0x11   :  { %18 = dma.hbm_to_vmem [thread:$0]  %s141_s0, 16, %s16_s10, [#allocation3]  }
  0x12   :  { %93 = dma.done.wait [#allocation3], 16  }
  0x13   :  { %94 = vsyncadd [#allocation3], 4294967280  ;;  %vm25_vm0 = vcmask 31744   ;;  %v24_v0 = vld [vmem:[#allocation2] sm:$0x1]  ;;  %s98_s24 = smov [#allocation5]  }
  0x14   :  { %v27_v1 = vld [vmem:[%s142_s1] sm:$0x1]  ;;  %v26_v2 = vsel %vm25_vm0, %v24_v0, 0.0  ;;  %s38_s25 = sshll.u32 %s98_s24, 4  ;;  %vm30_vm1 = vcmask 57344   ;;  %s39_s25 = int_to_ptr.vmem [resolvable:$true] %s38_s25 }
  0x15   :  { %v28_v3 = vadd.f32 %v27_v1, %v26_v2  ;;  %s71_s26 = scalar_lea.vmem %s39_s25, 16  ;;  %s75_s27 = scalar_lea.vmem %s39_s25, 32 }
  0x16   :  { %p72_p8 = scmp.ne.s32.totalorder %s39_s25, %s71_s26  ;;  %p76_p9 = scmp.lt.s32.totalorder %s39_s25, %s39_s25 }
  0x17   :  { %v29_v4 = vmax.f32 %v28_v3, 0.0  ;;  %p77_p10 = scmp.lt.s32.totalorder %s75_s27, %s71_s26 }
  0x19   :  { %31 = vst.msk [vmem:[#allocation5] sm:$0x1] %vm30_vm1, %v29_v4  ;;  %p78_p11 = por %p77_p10, %p76_p9 }
  0x1b   :  { %p79_p12 = pnand %p78_p11, %p72_p8 }
  0x1d   :  { %82 = shalt.err (!%p79_p12)
}
  0x1e   :  { %s83_s1 = scalar_lea.hbm %s143_s2, 16 }
  0x1f   :  { %p84_p13 = scmp.ne.s32.totalorder %s143_s2, %s83_s1  ;;  %p87_p0 = scmp.lt.u32.totalorder %s83_s1, %s143_s2 }
  0x21   :  { %p89_p1 = pnand %p87_p0, %p84_p13 }
  0x23   :  { %92 = shalt.err (!%p89_p1)
}
  0x24   :  { %41 = dma.vmem_to_hbm [thread:$0]  %s39_s25, 16, %s143_s2, [#allocation4]  }
  0x25   :  { %95 = dma.done.wait [#allocation4], 16  }
  0x26   :  { %96 = vsyncadd [#allocation4], 4294967280 }
  0x27   :  { %45 = vsyncpa [#allocation3], 1 }
  0x28   :  { %46 = vsyncpa [#allocation4], 1 }

</bundles_post_ra>
